<compile_context>
chip_gen: v7x
topology: tpu7x:2x2x1
jax: 0.10.0
libtpu: 0.0.40
codegen_flags: <defaults>
</compile_context>

<pallas_src>
import functools

import jax
import jax.numpy as jnp
from jax.experimental import pallas as pl
from jax.experimental.pallas import tpu as pltpu


# --------------------------------------------------------------------------- #
# Kernels
# --------------------------------------------------------------------------- #

def _broadcast_pos(pos, batch_reps):
    # pos: (g, cols).  The folded q rows are ordered [b0:chunk0..chunk(g-1), b1:chunk0, ...],
    # so replicating the g positional rows `batch_reps` times along sublanes matches rows.
    if batch_reps > 1:
        pos = jnp.concatenate([pos] * batch_reps, axis=0)   # sublane copy; XLU slot (free filler)
    return pos


def _pos_add_kernel(q_ref, pos_ref, o_ref, *, batch_reps):
    """Eval-mode forward: o = q + pos (pos broadcast over the batch)."""
    o_ref[...] = q_ref[...] + _broadcast_pos(pos_ref[...], batch_reps)


def _pos_add_dropout_hw_kernel(seed_ref, q_ref, pos_ref, o_ref, *,
                               batch_reps, thr16, thr32, scale, half_bits):
    """Train-mode forward on TPU: o = inverted-dropout(q + pos) using the HW PRNG."""
    y = q_ref[...] + _broadcast_pos(pos_ref[...], batch_reps)
    rows, cols = y.shape

    # Multi-word seed: user seed + tile coordinates -> independent streams per tile/call.
    pltpu.prng_seed(seed_ref[0], pl.program_id(0), pl.program_id(1))

    if half_bits:
        # One uint32 per TWO elements: split into two 16-bit threshold compares.
        bits = pltpu.prng_random_bits((rows, cols // 2))
        if bits.dtype != jnp.uint32:
            bits = pltpu.bitcast(bits, jnp.uint32)
        lo = bits & jnp.uint32(0xFFFF)
        hi = bits >> jnp.uint32(16)
        # cols//2 is a multiple of 128, so this lane-concat is just vreg placement.
        keep = jnp.concatenate([lo, hi], axis=1) >= jnp.uint32(thr16)
    else:
        bits = pltpu.prng_random_bits((rows, cols))
        if bits.dtype != jnp.uint32:
            bits = pltpu.bitcast(bits, jnp.uint32)
        keep = bits >= jnp.uint32(thr32)

    o_ref[...] = jnp.where(keep, y * jnp.asarray(scale, y.dtype), jnp.zeros((), y.dtype))


def _pos_add_dropout_mask_kernel(q_ref, pos_ref, rand_ref, o_ref, *, batch_reps, p, scale):
    """Portable train-mode forward (CPU / interpret): mask bits streamed from HBM."""
    y = q_ref[...] + _broadcast_pos(pos_ref[...], batch_reps)
    keep = rand_ref[...] >= jnp.float32(p)
    o_ref[...] = jnp.where(keep, y * jnp.asarray(scale, y.dtype), jnp.zeros((), y.dtype))


# --------------------------------------------------------------------------- #
# Wrapper helpers
# --------------------------------------------------------------------------- #

def _round_up(x, m):
    return (x + m - 1) // m * m


def _sublanes(itemsize):
    # Rows per packed sublane group: f32 -> 8, bf16/f16 -> 16, int8/fp8 -> 32.
    return max(8, 32 // itemsize)


def _default_vmem_budget():
    """Working-set budget for the double-buffered pipeline: ~1/4 of physical VMEM
    (~32 MiB on v5e/v6e with 128 MiB, ~16 MiB on v7x with 64 MiB)."""
    try:
        if jax.default_backend() == "tpu":
            return max(8 << 20, int(pltpu.get_tpu_info().vmem_capacity_bytes) // 4)
    except Exception:
        pass
    return 16 << 20


def _pick_col_block(total_cols, bytes_per_col, vmem_budget, min_steps=8):
    """Largest multiple of 128 that divides total_cols, fits the padded/double-buffered
    VMEM budget, and leaves >= min_steps column tiles (so a v7x 'parallel' axis can
    shard across both TensorCores) whenever the tensor is large enough."""
    cap = max(128, vmem_budget // max(bytes_per_col, 1))
    if total_cols >= 128 * min_steps:
        cap = min(cap, total_cols // min_steps)
    cap = min(cap, total_cols)
    m = total_cols // 128
    for d in range(min(cap // 128, m), 0, -1):
        if m % d == 0:
            return 128 * d
    return 128


# --------------------------------------------------------------------------- #
# Public wrapper
# --------------------------------------------------------------------------- #

def learn_positional_encoding(q, pos_weight, *, p=0.1, training=False, seed=0,
                              rng_key=None, donate_q=False, use_hw_prng=None,
                              vmem_budget_bytes=None):
    """Forward of LearnPositionalEncoding.

    q:          (bsz, d_model, q_frm)
    pos_weight: (max_len, d_model) with max_len == q_frm
    """
    bsz, d_model, q_frm = q.shape
    max_len, d_model_w = pos_weight.shape
    assert q_frm == max_len, (q_frm, pos_weight.shape)
    assert d_model == d_model_w

    dtype = q.dtype
    itemsize = jnp.dtype(dtype).itemsize
    sub = _sublanes(itemsize)

    if training and p >= 1.0:
        # torch semantics: everything dropped (also avoids inf scale / threshold overflow).
        return jnp.zeros_like(q)
    do_dropout = bool(training) and p > 0.0

    # ---- one-time XLA layout work (grid-invariant) ---------------------------------
    D = d_model * q_frm
    pos_row = jnp.transpose(pos_weight, (1, 0)).reshape(1, D).astype(dtype)
    q2d = q.reshape(bsz, D)

    # Pad the flattened feature axis to a 128 multiple (no full-extent fallback).
    Dp = _round_up(D, 128)
    if Dp != D:
        q2d = jnp.pad(q2d, ((0, 0), (0, Dp - D)))
        pos_row = jnp.pad(pos_row, ((0, 0), (0, Dp - D)))

    # ---- refold small batches so the sublane axis is dense --------------------------
    g = 1
    if bsz < sub:
        for cand in range(max(sub // bsz, 1), 0, -1):
            if Dp % (128 * cand) == 0:
                g = cand
                break
    rows, cols_total = bsz * g, Dp // g
    q2d = q2d.reshape(rows, cols_total)
    pos2d = pos_row.reshape(g, cols_total)
    batch_reps = bsz if g > 1 else 1

    # ---- tiling from a sublane-padded, double-buffered VMEM budget ------------------
    if vmem_budget_bytes is None:
        vmem_budget_bytes = _default_vmem_budget()

    MAX_BLOCK_ROWS = 2048                       # row tiling only kicks in for huge bsz (g==1)
    block_rows = rows if rows <= MAX_BLOCK_ROWS else MAX_BLOCK_ROWS
    rows_pad = _round_up(min(block_rows, rows), sub)
    pos_rows_pad = _round_up(g, sub)

    hw_prng = use_hw_prng if use_hw_prng is not None else (jax.default_backend() == "tpu")
    rand_bytes_per_col = rows_pad * 4 if (do_dropout and not hw_prng) else 0
    # q-in + out + pos (+ mask), each double-buffered, with sublane-padded row counts.
    bytes_per_col = 2 * (2 * rows_pad * itemsize + pos_rows_pad * itemsize + rand_bytes_per_col)
    block_cols = _pick_col_block(cols_total, bytes_per_col, vmem_budget_bytes)

    grid = (pl.cdiv(rows, block_rows), cols_total // block_cols)

    # NOTE: if the trace shows exposed DMA at step boundaries, sweep
    # pipeline_mode=pl.Buffered(3) on q_spec/out_spec (skip if already at HBM roofline).
    q_spec = pl.BlockSpec((block_rows, block_cols), lambda i, j: (i, j))
    pos_spec = pl.BlockSpec((g, block_cols), lambda i, j: (0, j))
    out_spec = pl.BlockSpec((block_rows, block_cols), lambda i, j: (i, j))
    out_shape = jax.ShapeDtypeStruct((rows, cols_total), dtype)

    cparams = pltpu.CompilerParams(
        # On v7x, verify in xprof that both TensorCores are busy; if the column axis is
        # not sharded, switch it to pltpu.CORE_PARALLEL (or an explicit core grid axis).
        dimension_semantics=("parallel", "parallel"),
        vmem_limit_bytes=max(32 << 20, 2 * int(vmem_budget_bytes)),
    )

    if not do_dropout:
        out2d = pl.pallas_call(
            functools.partial(_pos_add_kernel, batch_reps=batch_reps),
            out_shape=out_shape, grid=grid,
            in_specs=[q_spec, pos_spec], out_specs=out_spec,
            compiler_params=cparams,
            input_output_aliases=({0: 0} if donate_q else {}),
        )(q2d, pos2d)
    elif hw_prng:
        thr32 = min(int(round(p * 4294967296.0)), 4294967295)   # P(drop) = p
        thr16 = min(int(round(p * 65536.0)), 65535)
        scale = 1.0 / (1.0 - p)
        half_bits = (block_cols % 256 == 0)                      # 16-bit split needs 128-lane halves
        seed_arr = jnp.asarray([seed], dtype=jnp.int32)
        out2d = pl.pallas_call(
            functools.partial(_pos_add_dropout_hw_kernel, batch_reps=batch_reps,
                              thr16=thr16, thr32=thr32, scale=scale, half_bits=half_bits),
            out_shape=out_shape, grid=grid,
            in_specs=[pl.BlockSpec(memory_space=pltpu.SMEM), q_spec, pos_spec],
            out_specs=out_spec, compiler_params=cparams,
            input_output_aliases=({1: 0} if donate_q else {}),
        )(seed_arr, q2d, pos2d)
    else:
        # Portable path (CPU / interpret mode): pltpu.prng_* has no lowering there, so the
        # mask bits come from jax.random and are streamed through the same tiling.
        scale = 1.0 / (1.0 - p)
        key = rng_key if rng_key is not None else jax.random.PRNGKey(seed)
        rand = jax.random.uniform(key, (rows, cols_total), dtype=jnp.float32)
        rand_spec = pl.BlockSpec((block_rows, block_cols), lambda i, j: (i, j))
        out2d = pl.pallas_call(
            functools.partial(_pos_add_dropout_mask_kernel, batch_reps=batch_reps,
                              p=float(p), scale=scale),
            out_shape=out_shape, grid=grid,
            in_specs=[q_spec, pos_spec, rand_spec], out_specs=out_spec,
            compiler_params=cparams,
            input_output_aliases=({0: 0} if donate_q else {}),
        )(q2d, pos2d, rand)

    out = out2d.reshape(bsz, Dp)
    if Dp != D:
        out = out[:, :D]
    return out.reshape(bsz, d_model, q_frm)


# --------------------------------------------------------------------------- #
# Main
# --------------------------------------------------------------------------- #

if __name__ == "__main__":
    key = jax.random.PRNGKey(0)
    k_pos, k_q, k_drop = jax.random.split(key, 3)

    bsz, d_model, max_len = 2, 32, 16      # q_frm must equal max_len (asserted by the module)
    p = 0.1

    # nn.init.uniform_ -> U[0, 1)
    pos_weight = jax.random.uniform(k_pos, (max_len, d_model), dtype=jnp.float32)
    q = jax.random.normal(k_q, (bsz, d_model, max_len), dtype=jnp.float32)

    # Pure-JAX reference.
    ref = q + jnp.transpose(pos_weight, (1, 0))[None, :, :]

    # Eval-mode forward (dropout is identity), matching module.eval().
    out = learn_positional_encoding(q, pos_weight, p=p, training=False)
    out = jax.block_until_ready(out)
    assert out.shape == q.shape and out.dtype == q.dtype
    assert jnp.allclose(out, ref, atol=1e-5, rtol=1e-5), float(jnp.max(jnp.abs(out - ref)))

    # Train-mode forward: each element is either 0 (dropped) or ref / (1 - p).
    # TODO(synk): dropout mask uses the TPU hardware PRNG (or jax.random off-TPU),
    #             not torch's RNG stream, so per-element masks differ from PyTorch.
    out_tr = learn_positional_encoding(q, pos_weight, p=p, training=True, seed=123, rng_key=k_drop)
    out_tr = jax.block_until_ready(out_tr)
    scaled = ref / (1.0 - p)
    ok = (jnp.abs(out_tr) <= 1e-12) | (jnp.abs(out_tr - scaled) <= 1e-4)
    assert bool(jnp.all(ok))
    drop_frac = float(jnp.mean((out_tr == 0.0).astype(jnp.float32)))
    assert 0.01 <= drop_frac <= 0.5, drop_frac     # loose sanity: ~10% dropped over 1024 elems

    print("KERNEL_OK")
</pallas_src>

<mosaic_0001>
module attributes {stable_mosaic.version = 11 : i64} {
  func.func @_pos_add_kernel(%arg0: i32, %arg1: i32, %arg2: memref<8x128xf32, #tpu.memory_space<vmem>>, %arg3: memref<4x128xf32, #tpu.memory_space<vmem>>, %arg4: memref<8x128xf32, #tpu.memory_space<vmem>>) attributes {dimension_semantics = [#tpu.dimension_semantics<parallel>, #tpu.dimension_semantics<parallel>], iteration_bounds = array<i64: 1, 1>, scalar_prefetch = 0 : i64, scratch_operands = 0 : i64, tpu.core_type = #tpu.core_type<tc>, window_params = [{transform_indices = @transform_0, window_bounds = array<i64: 8, 128>}, {transform_indices = @transform_1, window_bounds = array<i64: 4, 128>}, {transform_indices = @transform_2, window_bounds = array<i64: 8, 128>}]} {
    %c0 = arith.constant 0 : index
    %c0_0 = arith.constant 0 : index
    %0 = vector.load %arg2[%c0, %c0_0] : memref<8x128xf32, #tpu.memory_space<vmem>>, vector<8x128xf32>
    %c0_1 = arith.constant 0 : index
    %c0_2 = arith.constant 0 : index
    %1 = vector.load %arg3[%c0_1, %c0_2] : memref<4x128xf32, #tpu.memory_space<vmem>>, vector<4x128xf32>
    %2 = tpu.concatenate %1, %1 in 0 : vector<4x128xf32>, vector<4x128xf32> -> vector<8x128xf32>
    %3 = arith.addf %0, %2 : vector<8x128xf32>
    %c0_3 = arith.constant 0 : index
    %c0_4 = arith.constant 0 : index
    %4 = vector.load %arg4[%c0_3, %c0_4] : memref<8x128xf32, #tpu.memory_space<vmem>>, vector<8x128xf32>
    tpu.vector_store %arg4[%c0_3, %c0_4], %3 {strides = array<i32>} : memref<8x128xf32, #tpu.memory_space<vmem>>, vector<8x128xf32>,
    return
  }
  func.func @transform_0(%arg0: i32, %arg1: i32) -> (i32, i32) {
    %c0_i32 = arith.constant 0 : i32
    return %arg0, %arg1 : i32, i32
  }
  func.func @transform_1(%arg0: i32, %arg1: i32) -> (i32, i32) {
    %c0_i32 = arith.constant 0 : i32
    %c0_i32_0 = arith.constant 0 : i32
    return %c0_i32, %arg1 : i32, i32
  }
  func.func @transform_2(%arg0: i32, %arg1: i32) -> (i32, i32) {
    %c0_i32 = arith.constant 0 : i32
    return %arg0, %arg1 : i32, i32
  }
}

</mosaic_0001>

<bundles_post_ra>
// kernel: tpu_custom_call.1
= control target key start
LH: loop header
LB: loop body
LE: loop exit
PB: predicated region body
PF: predicated region fallthrough
CT: control target
= control target key end

     0   :  { %7 = vsyncpa [#allocation3], 0  ;;  %s190_s0 = inlined_call_operand.hbm [shape: f32[8,128], index: 0, kind: input, shape index: {}]   ;;  %s191_s1 = inlined_call_operand.hbm [shape: f32[4,128], index: 1, kind: input, shape index: {}]   ;;  %s192_s2 = inlined_call_operand.hbm [shape: f32[8,128], index: 2, kind: output, shape index: {}]  }
   0x1   :  { %8 = vsyncpa [#allocation6], 0 }
   0x2   :  { %9 = vsyncpa [#allocation4], 0  ;;  %s136_s9 = smov [#allocation2]   ;;  %s137_s11 = smov [#allocation5]  }
   0x3   :  { %s16_s10 = sshll.u32 %s136_s9, 4  ;;  %s26_s12 = sshll.u32 %s137_s11, 4  ;;  %s17_s10 = int_to_ptr.vmem [resolvable:$true] %s16_s10  ;;  %s27_s12 = int_to_ptr.vmem [resolvable:$true] %s26_s12 }
   0x4   :  { %s64_s15 = scalar_lea.hbm %s190_s0, 128 }
   0x5   :  { %p65_p0 = scmp.ne.s32.totalorder %s190_s0, %s64_s15  ;;  %p68_p1 = scmp.lt.u32.totalorder %s64_s15, %s190_s0 }
   0x7   :  { %p70_p2 = pnand %p68_p1, %p65_p0 }
   0x9   :  { %73 = shalt.err (!%p70_p2)
}
   0xa   :  { %s74_s20 = scalar_lea.vmem %s17_s10, 128  ;;  %p79_p4 = scmp.lt.s32.totalorder %s17_s10, %s17_s10 }
   0xb   :  { %p75_p3 = scmp.ne.s32.totalorder %s17_s10, %s74_s20  ;;  %p80_p5 = scmp.lt.s32.totalorder %s74_s20, %s74_s20 }
   0xd   :  { %p81_p6 = por %p80_p5, %p79_p4 }
   0xf   :  { %p82_p7 = pnand %p81_p6, %p75_p3 }
  0x11   :  { %85 = shalt.err (!%p82_p7)
}
  0x12   :  { %19 = dma.hbm_to_vmem [thread:$0]  %s190_s0, 128, %s17_s10, [#allocation3]  }
  0x13   :  { %s86_s25 = scalar_lea.hbm %s191_s1, 64 }
  0x14   :  { %p87_p8 = scmp.ne.s32.totalorder %s191_s1, %s86_s25  ;;  %p90_p9 = scmp.lt.u32.totalorder %s86_s25, %s191_s1 }
  0x16   :  { %p92_p10 = pnand %p90_p9, %p87_p8 }
  0x18   :  { %95 = shalt.err (!%p92_p10)
}
  0x19   :  { %s96_s30 = scalar_lea.vmem %s27_s12, 64  ;;  %p101_p12 = scmp.lt.s32.totalorder %s27_s12, %s27_s12 }
  0x1a   :  { %p97_p11 = scmp.ne.s32.totalorder %s27_s12, %s96_s30  ;;  %p102_p13 = scmp.lt.s32.totalorder %s96_s30, %s96_s30 }
  0x1c   :  { %p103_p0 = por %p102_p13, %p101_p12 }
  0x1e   :  { %p104_p1 = pnand %p103_p0, %p97_p11 }
  0x20   :  { %107 = shalt.err (!%p104_p1)
}
  0x21   :  { %29 = dma.hbm_to_vmem [thread:$0]  %s191_s1, 64, %s27_s12, [#allocation6]  }
  0x22   :  { %130 = dma.done.wait [#allocation3], 128  }
  0x23   :  { %131 = vsyncadd [#allocation3], 4294967168 }
  0x24   :  { %132 = dma.done.wait [#allocation6], 64  }
  0x25   :  { %133 = vsyncadd [#allocation6], 4294967232  ;;  %v37_v0 = vld [vmem:[#allocation5] sm:$0xf]  ;;  %vm41_vm0 = vcmask 1043456   ;;  %v36_v1 = vld [vmem:[#allocation2] sm:$0xff] }
  0x26   :  { %v39_v2 = vrot.slane %v37_v0, 4  ;;  %s138_s4 = smov [#allocation7]  }
  0x27   :  { %s51_s5 = sshll.u32 %s138_s4, 4  ;;  %s52_s5 = int_to_ptr.vmem [resolvable:$true] %s51_s5 }
  0x28   :  { %v42_v3 = vsel %vm41_vm0, %v37_v0, %v39_v2  ;;  %s108_s6 = scalar_lea.vmem %s52_s5, 128  ;;  %p113_p3 = scmp.lt.s32.totalorder %s52_s5, %s52_s5 }
  0x29   :  { %v43_v4 = vadd.f32 %v42_v3, %v36_v1  ;;  %p109_p2 = scmp.ne.s32.totalorder %s52_s5, %s108_s6  ;;  %p114_p4 = scmp.lt.s32.totalorder %s108_s6, %s108_s6 }
  0x2b   :  { %44 = vst [vmem:[#allocation7] sm:$0xff] %v43_v4  ;;  %p115_p5 = por %p114_p4, %p113_p3 }
  0x2d   :  { %p116_p6 = pnand %p115_p5, %p109_p2 }
  0x2f   :  { %119 = shalt.err (!%p116_p6)
}
  0x30   :  { %s120_s8 = scalar_lea.hbm %s192_s2, 128 }
  0x31   :  { %p121_p7 = scmp.ne.s32.totalorder %s192_s2, %s120_s8  ;;  %p124_p8 = scmp.lt.u32.totalorder %s120_s8, %s192_s2 }
  0x33   :  { %p126_p9 = pnand %p124_p8, %p121_p7 }
  0x35   :  { %129 = shalt.err (!%p126_p9)
}
  0x36   :  { %54 = dma.vmem_to_hbm [thread:$0]  %s52_s5, 128, %s192_s2, [#allocation4]  }
  0x37   :  { %134 = dma.done.wait [#allocation4], 128  }
  0x38   :  { %135 = vsyncadd [#allocation4], 4294967168 }
  0x39   :  { %58 = vsyncpa [#allocation3], 1 }
  0x3a   :  { %59 = vsyncpa [#allocation6], 1 }
  0x3b   :  { %60 = vsyncpa [#allocation4], 1 }

</bundles_post_ra>
